<compile_context>
chip_gen: v7x
topology: tpu7x:2x2x1
jax: 0.10.0
libtpu: 0.0.40
codegen_flags: <defaults>
</compile_context>

<pallas_src>
import math

import jax
import jax.numpy as jnp
from jax.experimental import pallas as pl
from jax.experimental.pallas import tpu as pltpu  # noqa: F401  (TPU backend; kept for parity)

# ----------------------------- config -------------------------------------
B = 2            # batch
T = 8            # sequence length (block_size)
C = 32           # n_embd
NH = 4           # n_head
HD = C // NH     # head dim
N = B * T        # fused row count (whole batch in one kernel step)
LN_EPS = 1e-5    # PyTorch nn.LayerNorm default
NEG_INF = -1e30  # finite mask fill

# ---- packed f32 vector slab (vecs): (VEC_ROWS, 128) -----------------------
ROW_LN1W, ROW_LN1B, ROW_LN2W, ROW_LN2B = 0, 1, 2, 3
ROW_BQKV = 4          # [b_q | b_k | b_v | 0]  (full 128 lanes, fused bias add)
ROW_BPROJ = 5         # lanes 0:C
ROW_BFC = 6           # lanes 0:4C
ROW_BFC2 = 7          # lanes 0:C
ROW_HMASK = 8         # rows 8..8+NH-1, lanes 0:C : per-head 0/1 lane masks
ROW_AMASK = 16        # rows 16..16+N-1, lanes 0:N : additive causal mask
VEC_ROWS = 32

# ---- packed bf16 weight slab (w_big): (W_ROWS, 128) -----------------------
WROW_QKV = 0          # rows 0:C,        lanes 0:3C : [Wq | Wk | Wv]  (rest 0)
WROW_FC = 32          # rows 32:32+C,    lanes 0:4C : Wfc
WROW_PROJ = 64        # rows 64:64+C,    lanes 0:C  : Wproj
WROW_FC2 = 96         # rows 96:96+4C,   lanes 0:C  : Wfc2
W_ROWS = WROW_FC2 + 4 * C   # 224 (multiple of 16 -> native bf16 sublane tile)


def _layernorm(v, w, b):
    mu = jnp.mean(v, axis=-1, keepdims=True)
    var = jnp.mean((v - mu) * (v - mu), axis=-1, keepdims=True)
    return (v - mu) * jax.lax.rsqrt(var + LN_EPS) * w + b


def _gelu(x):
    # GPT "new gelu" (tanh approximation) — maps onto the TPU EUP.
    return 0.5 * x * (1.0 + jnp.tanh(
        math.sqrt(2.0 / math.pi) * (x + 0.044715 * x * x * x)))


def block_kernel(x_ref, w_ref, vec_ref, o_ref):
    # Single invocation (grid=()): x is the full (N, C) = (B*T, C) slab.
    x = x_ref[...].astype(jnp.float32)                          # (N, C) f32

    # ---- unpack vector slab (all slices start at lane 0 -> no relayout) ----
    ln1w = vec_ref[ROW_LN1W:ROW_LN1W + 1, 0:C]
    ln1b = vec_ref[ROW_LN1B:ROW_LN1B + 1, 0:C]
    ln2w = vec_ref[ROW_LN2W:ROW_LN2W + 1, 0:C]
    ln2b = vec_ref[ROW_LN2B:ROW_LN2B + 1, 0:C]
    b_qkv = vec_ref[ROW_BQKV:ROW_BQKV + 1, :]                   # (1, 128)
    b_proj = vec_ref[ROW_BPROJ:ROW_BPROJ + 1, 0:C]
    b_fc = vec_ref[ROW_BFC:ROW_BFC + 1, :]                      # (1, 128)
    b_fc2 = vec_ref[ROW_BFC2:ROW_BFC2 + 1, 0:C]
    amask = vec_ref[ROW_AMASK:ROW_AMASK + N, 0:N]               # (N, N) additive

    # ---- attention branch ---------------------------------------------------
    h = _layernorm(x, ln1w, ln1b)                               # (N, C) f32
    h16 = h.astype(jnp.bfloat16)

    # Fused QKV projection: one (N,C)@(C,128) matmul against [Wq|Wk|Wv|0]
    # (Wq / b_q pre-scaled by 1/sqrt(HD) at pack time) + one fused bias add.
    w_qkv = w_ref[WROW_QKV:WROW_QKV + C, :]                     # (C, 128) bf16
    qkv = jnp.dot(h16, w_qkv, preferred_element_type=jnp.float32) + b_qkv
    q = qkv[:, 0:C]                                             # (N, C)
    k = qkv[:, C:2 * C]
    v = qkv[:, 2 * C:3 * C]
    q16 = q.astype(jnp.bfloat16)

    # Full-width masked per-head matmuls; summing the (lane-disjoint) head
    # outputs reconstructs the concatenated multi-head output for free.
    attn = jnp.zeros((N, C), jnp.float32)
    for head in range(NH):                                      # static unroll
        hmask = vec_ref[ROW_HMASK + head:ROW_HMASK + head + 1, 0:C]  # (1, C) 0/1
        k_h = (k * hmask).astype(jnp.bfloat16)                  # zero non-head lanes
        v_h = (v * hmask).astype(jnp.bfloat16)
        s = jnp.dot(q16, k_h.T, preferred_element_type=jnp.float32)  # (N, N)
        s = s + amask                                           # causal block-diag
        s = s - jnp.max(s, axis=-1, keepdims=True)              # keep for robustness
        p = jnp.exp(s)
        p = p * pl.reciprocal(jnp.sum(p, axis=-1, keepdims=True), approx=True)
        attn = attn + jnp.dot(p.astype(jnp.bfloat16), v_h,
                              preferred_element_type=jnp.float32)  # (N, C)

    w_proj = w_ref[WROW_PROJ:WROW_PROJ + C, 0:C]                # (C, C) bf16
    attn = jnp.dot(attn.astype(jnp.bfloat16), w_proj,
                   preferred_element_type=jnp.float32) + b_proj

    x = x + attn                                                # residual 1

    # ---- MLP branch ---------------------------------------------------------
    h2 = _layernorm(x, ln2w, ln2b)                              # (N, C) f32
    w_fc = w_ref[WROW_FC:WROW_FC + C, :]                        # (C, 4C) bf16
    f = jnp.dot(h2.astype(jnp.bfloat16), w_fc,
                preferred_element_type=jnp.float32) + b_fc      # (N, 4C)
    f = _gelu(f)
    w_fc2 = w_ref[WROW_FC2:WROW_FC2 + 4 * C, 0:C]               # (4C, C) bf16
    f = jnp.dot(f.astype(jnp.bfloat16), w_fc2,
                preferred_element_type=jnp.float32) + b_fc2     # (N, C)

    o_ref[...] = (x + f).astype(o_ref.dtype)                    # residual 2


def ramanujan_block(x, params):
    """x: (B, T, C) float32.  params: dict with packed 'w_big' and 'vecs'."""
    Bn, Tn, Cn = x.shape
    assert (Bn, Tn, Cn) == (B, T, C)

    x2 = x.reshape(N, C)   # fuse batch & sequence into one slab

    out = pl.pallas_call(
        block_kernel,
        out_shape=jax.ShapeDtypeStruct((N, C), x.dtype),
    )(x2, params["w_big"], params["vecs"])

    return out.reshape(B, T, C)


def init_params(key):
    ks = jax.random.split(key, 6)
    std = 0.02
    scale = 1.0 / math.sqrt(HD)   # attention score scale, folded into Wq / b_q

    def w(k, shape, mult=1.0):
        return (mult * std) * jax.random.normal(k, shape, jnp.float32)

    # Linear weights stored (in_features, out_features) = PyTorch weight.T.
    w_q = w(ks[0], (C, C), mult=scale)
    w_k = w(ks[1], (C, C))
    w_v = w(ks[2], (C, C))
    w_proj = w(ks[3], (C, C))
    w_fc = w(ks[4], (C, 4 * C))
    w_fc2 = w(ks[5], (4 * C, C))

    # Biases / LN params (PyTorch default init: LN weight=1, all biases=0).
    b_q = jnp.zeros((C,), jnp.float32) * scale   # pre-scaled (matters for real ckpts)
    b_k = jnp.zeros((C,), jnp.float32)
    b_v = jnp.zeros((C,), jnp.float32)
    b_proj = jnp.zeros((C,), jnp.float32)
    b_fc = jnp.zeros((4 * C,), jnp.float32)
    b_fc2 = jnp.zeros((C,), jnp.float32)
    ln1_w = jnp.ones((C,), jnp.float32)
    ln1_b = jnp.zeros((C,), jnp.float32)
    ln2_w = jnp.ones((C,), jnp.float32)
    ln2_b = jnp.zeros((C,), jnp.float32)

    # ---- pack all matmul weights into one lane/sublane-aligned bf16 slab ----
    w_big = jnp.zeros((W_ROWS, 128), jnp.float32)
    w_big = w_big.at[WROW_QKV:WROW_QKV + C, 0:C].set(w_q)
    w_big = w_big.at[WROW_QKV:WROW_QKV + C, C:2 * C].set(w_k)
    w_big = w_big.at[WROW_QKV:WROW_QKV + C, 2 * C:3 * C].set(w_v)
    w_big = w_big.at[WROW_FC:WROW_FC + C, 0:4 * C].set(w_fc)
    w_big = w_big.at[WROW_PROJ:WROW_PROJ + C, 0:C].set(w_proj)
    w_big = w_big.at[WROW_FC2:WROW_FC2 + 4 * C, 0:C].set(w_fc2)
    w_big = w_big.astype(jnp.bfloat16)   # MXU-native operand dtype

    # ---- pack LN params, biases, head masks and causal mask into one slab ---
    vecs = jnp.zeros((VEC_ROWS, 128), jnp.float32)
    vecs = vecs.at[ROW_LN1W, 0:C].set(ln1_w)
    vecs = vecs.at[ROW_LN1B, 0:C].set(ln1_b)
    vecs = vecs.at[ROW_LN2W, 0:C].set(ln2_w)
    vecs = vecs.at[ROW_LN2B, 0:C].set(ln2_b)
    vecs = vecs.at[ROW_BQKV, 0:C].set(b_q)
    vecs = vecs.at[ROW_BQKV, C:2 * C].set(b_k)
    vecs = vecs.at[ROW_BQKV, 2 * C:3 * C].set(b_v)
    vecs = vecs.at[ROW_BPROJ, 0:C].set(b_proj)
    vecs = vecs.at[ROW_BFC, 0:4 * C].set(b_fc)
    vecs = vecs.at[ROW_BFC2, 0:C].set(b_fc2)
    for h in range(NH):
        vecs = vecs.at[ROW_HMASK + h, h * HD:(h + 1) * HD].set(1.0)
    # Additive block-diagonal causal mask over fused (B*T) rows:
    # row i attends to col j iff (i//T == j//T) and (j <= i).
    row = jnp.arange(N)[:, None]
    col = jnp.arange(N)[None, :]
    allow = (row // T == col // T) & (col <= row)
    vecs = vecs.at[ROW_AMASK:ROW_AMASK + N, 0:N].set(
        jnp.where(allow, 0.0, NEG_INF).astype(jnp.float32))

    return {"w_big": w_big, "vecs": vecs}


if __name__ == "__main__":
    key = jax.random.PRNGKey(0)
    kx, kp = jax.random.split(key)
    x = jax.random.normal(kx, (B, T, C), jnp.float32)
    params = init_params(kp)

    out = ramanujan_block(x, params)
    out = jax.block_until_ready(out)
    assert out.shape == (B, T, C) and out.dtype == jnp.float32
    assert bool(jnp.all(jnp.isfinite(out)))
    print("KERNEL_OK")
</pallas_src>

<mosaic_0001>
module attributes {stable_mosaic.version = 11 : i64} {
  func.func @block_kernel(%arg0: memref<16x32xf32, #tpu.memory_space<vmem>>, %arg1: memref<224x128xbf16, #tpu.memory_space<vmem>>, %arg2: memref<32x128xf32, #tpu.memory_space<vmem>>, %arg3: memref<16x32xf32, #tpu.memory_space<vmem>>) attributes {dimension_semantics = [], scalar_prefetch = 0 : i64, scratch_operands = 0 : i64, tpu.core_type = #tpu.core_type<tc>} {
    %c0 = arith.constant 0 : index
    %c0_0 = arith.constant 0 : index
    %0 = vector.load %arg0[%c0, %c0_0] : memref<16x32xf32, #tpu.memory_space<vmem>>, vector<16x32xf32>
    %c0_1 = arith.constant 0 : index
    %c0_2 = arith.constant 0 : index
    %1 = vector.load %arg2[%c0_1, %c0_2] : memref<32x128xf32, #tpu.memory_space<vmem>>, vector<1x32xf32>
    %c1 = arith.constant 1 : index
    %c0_3 = arith.constant 0 : index
    %2 = vector.load %arg2[%c1, %c0_3] : memref<32x128xf32, #tpu.memory_space<vmem>>, vector<1x32xf32>
    %c2 = arith.constant 2 : index
    %c0_4 = arith.constant 0 : index
    %3 = vector.load %arg2[%c2, %c0_4] : memref<32x128xf32, #tpu.memory_space<vmem>>, vector<1x32xf32>
    %c3 = arith.constant 3 : index
    %c0_5 = arith.constant 0 : index
    %4 = vector.load %arg2[%c3, %c0_5] : memref<32x128xf32, #tpu.memory_space<vmem>>, vector<1x32xf32>
    %c4 = arith.constant 4 : index
    %c0_6 = arith.constant 0 : index
    %5 = vector.load %arg2[%c4, %c0_6] : memref<32x128xf32, #tpu.memory_space<vmem>>, vector<1x128xf32>
    %c5 = arith.constant 5 : index
    %c0_7 = arith.constant 0 : index
    %6 = vector.load %arg2[%c5, %c0_7] : memref<32x128xf32, #tpu.memory_space<vmem>>, vector<1x32xf32>
    %c6 = arith.constant 6 : index
    %c0_8 = arith.constant 0 : index
    %7 = vector.load %arg2[%c6, %c0_8] : memref<32x128xf32, #tpu.memory_space<vmem>>, vector<1x128xf32>
    %c7 = arith.constant 7 : index
    %c0_9 = arith.constant 0 : index
    %8 = vector.load %arg2[%c7, %c0_9] : memref<32x128xf32, #tpu.memory_space<vmem>>, vector<1x32xf32>
    %c16 = arith.constant 16 : index
    %c0_10 = arith.constant 0 : index
    %9 = vector.load %arg2[%c16, %c0_10] : memref<32x128xf32, #tpu.memory_space<vmem>>, vector<16x16xf32>
    %cst = arith.constant dense<0.000000e+00> : vector<16xf32>
    %10 = vector.multi_reduction <add>, %0, %cst [1] : vector<16x32xf32> to vector<16xf32>
    %11 = vector.shape_cast %10 : vector<16xf32> to vector<16x1xf32>
    %cst_11 = arith.constant 3.200000e+01 : f32
    %12 = vector.broadcast %cst_11 : f32 to vector<16x1xf32>
    %13 = arith.divf %11, %12 : vector<16x1xf32>
    %14 = vector.broadcast %13 : vector<16x1xf32> to vector<16x32xf32>
    %15 = arith.subf %0, %14 : vector<16x32xf32>
    %16 = vector.broadcast %13 : vector<16x1xf32> to vector<16x32xf32>
    %17 = arith.subf %0, %16 : vector<16x32xf32>
    %18 = arith.mulf %15, %17 : vector<16x32xf32>
    %cst_12 = arith.constant dense<0.000000e+00> : vector<16xf32>
    %19 = vector.multi_reduction <add>, %18, %cst_12 [1] : vector<16x32xf32> to vector<16xf32>
    %20 = vector.shape_cast %19 : vector<16xf32> to vector<16x1xf32>
    %cst_13 = arith.constant 3.200000e+01 : f32
    %21 = vector.broadcast %cst_13 : f32 to vector<16x1xf32>
    %22 = arith.divf %20, %21 : vector<16x1xf32>
    %23 = vector.broadcast %13 : vector<16x1xf32> to vector<16x32xf32>
    %24 = arith.subf %0, %23 : vector<16x32xf32>
    %cst_14 = arith.constant 9.99999974E-6 : f32
    %25 = vector.broadcast %cst_14 : f32 to vector<16x1xf32>
    %26 = arith.addf %22, %25 : vector<16x1xf32>
    %27 = math.rsqrt %26 : vector<16x1xf32>
    %28 = vector.broadcast %27 : vector<16x1xf32> to vector<16x32xf32>
    %29 = arith.mulf %24, %28 : vector<16x32xf32>
    %30 = vector.broadcast %1 : vector<1x32xf32> to vector<16x32xf32>
    %31 = arith.mulf %29, %30 : vector<16x32xf32>
    %32 = vector.broadcast %2 : vector<1x32xf32> to vector<16x32xf32>
    %33 = arith.addf %31, %32 : vector<16x32xf32>
    %34 = arith.truncf %33 : vector<16x32xf32> to vector<16x32xbf16>
    %c0_15 = arith.constant 0 : index
    %c0_16 = arith.constant 0 : index
    %35 = vector.load %arg1[%c0_15, %c0_16] : memref<224x128xbf16, #tpu.memory_space<vmem>>, vector<32x128xbf16>
    %cst_17 = arith.constant dense<0.000000e+00> : vector<16x128xf32>
    %36 = tpu.matmul %34, %35, %cst_17 {dimension_numbers = #tpu.dot_dimension_numbers<[1], [0], [0], [1], [0, 0, 1, 1], [], []>} : vector<16x32xbf16>, vector<32x128xbf16>, vector<16x128xf32> -> vector<16x128xf32>
    %37 = vector.broadcast %5 : vector<1x128xf32> to vector<16x128xf32>
    %38 = arith.addf %36, %37 : vector<16x128xf32>
    %39 = vector.extract_strided_slice %38 {offsets = [0, 0], sizes = [16, 32], strides = [1, 1]} : vector<16x128xf32> to vector<16x32xf32>
    %40 = vector.extract_strided_slice %38 {offsets = [0, 32], sizes = [16, 32], strides = [1, 1]} : vector<16x128xf32> to vector<16x32xf32>
    %41 = vector.extract_strided_slice %38 {offsets = [0, 64], sizes = [16, 32], strides = [1, 1]} : vector<16x128xf32> to vector<16x32xf32>
    %42 = arith.truncf %39 : vector<16x32xf32> to vector<16x32xbf16>
    %cst_18 = arith.constant 0.000000e+00 : f32
    %43 = vector.broadcast %cst_18 : f32 to vector<16x32xf32>
    %c8 = arith.constant 8 : index
    %c0_19 = arith.constant 0 : index
    %44 = vector.load %arg2[%c8, %c0_19] : memref<32x128xf32, #tpu.memory_space<vmem>>, vector<1x32xf32>
    %45 = vector.broadcast %44 : vector<1x32xf32> to vector<16x32xf32>
    %46 = arith.mulf %40, %45 : vector<16x32xf32>
    %47 = arith.truncf %46 : vector<16x32xf32> to vector<16x32xbf16>
    %48 = vector.broadcast %44 : vector<1x32xf32> to vector<16x32xf32>
    %49 = arith.mulf %41, %48 : vector<16x32xf32>
    %50 = arith.truncf %49 : vector<16x32xf32> to vector<16x32xbf16>
    %51 = tpu.transpose %47, [1, 0] : vector<16x32xbf16> -> vector<32x16xbf16>
    %cst_20 = arith.constant dense<0.000000e+00> : vector<16x16xf32>
    %52 = tpu.matmul %42, %51, %cst_20 {dimension_numbers = #tpu.dot_dimension_numbers<[1], [0], [0], [1], [0, 0, 1, 1], [], []>} : vector<16x32xbf16>, vector<32x16xbf16>, vector<16x16xf32> -> vector<16x16xf32>
    %53 = arith.addf %52, %9 : vector<16x16xf32>
    %cst_21 = arith.constant dense<0xFF800000> : vector<16xf32>
    %54 = vector.multi_reduction <maximumf>, %53, %cst_21 [1] : vector<16x16xf32> to vector<16xf32>
    %55 = vector.shape_cast %54 : vector<16xf32> to vector<16x1xf32>
    %56 = vector.broadcast %55 : vector<16x1xf32> to vector<16x16xf32>
    %57 = arith.subf %53, %56 : vector<16x16xf32>
    %58 = math.exp %57 : vector<16x16xf32>
    %cst_22 = arith.constant dense<0.000000e+00> : vector<16xf32>
    %59 = vector.multi_reduction <add>, %58, %cst_22 [1] : vector<16x16xf32> to vector<16xf32>
    %60 = vector.shape_cast %59 : vector<16xf32> to vector<16x1xf32>
    %61 = tpu.reciprocal %60 {approx = true} : vector<16x1xf32> -> vector<16x1xf32>
    %62 = vector.broadcast %61 : vector<16x1xf32> to vector<16x16xf32>
    %63 = arith.mulf %58, %62 : vector<16x16xf32>
    %64 = arith.truncf %63 : vector<16x16xf32> to vector<16x16xbf16>
    %cst_23 = arith.constant dense<0.000000e+00> : vector<16x32xf32>
    %65 = tpu.matmul %64, %50, %cst_23 {dimension_numbers = #tpu.dot_dimension_numbers<[1], [0], [0], [1], [0, 0, 1, 1], [], []>} : vector<16x16xbf16>, vector<16x32xbf16>, vector<16x32xf32> -> vector<16x32xf32>
    %66 = arith.addf %43, %65 : vector<16x32xf32>
    %c9 = arith.constant 9 : index
    %c0_24 = arith.constant 0 : index
    %67 = vector.load %arg2[%c9, %c0_24] : memref<32x128xf32, #tpu.memory_space<vmem>>, vector<1x32xf32>
    %68 = vector.broadcast %67 : vector<1x32xf32> to vector<16x32xf32>
    %69 = arith.mulf %40, %68 : vector<16x32xf32>
    %70 = arith.truncf %69 : vector<16x32xf32> to vector<16x32xbf16>
    %71 = vector.broadcast %67 : vector<1x32xf32> to vector<16x32xf32>
    %72 = arith.mulf %41, %71 : vector<16x32xf32>
    %73 = arith.truncf %72 : vector<16x32xf32> to vector<16x32xbf16>
    %74 = tpu.transpose %70, [1, 0] : vector<16x32xbf16> -> vector<32x16xbf16>
    %cst_25 = arith.constant dense<0.000000e+00> : vector<16x16xf32>
    %75 = tpu.matmul %42, %74, %cst_25 {dimension_numbers = #tpu.dot_dimension_numbers<[1], [0], [0], [1], [0, 0, 1, 1], [], []>} : vector<16x32xbf16>, vector<32x16xbf16>, vector<16x16xf32> -> vector<16x16xf32>
    %76 = arith.addf %75, %9 : vector<16x16xf32>
    %cst_26 = arith.constant dense<0xFF800000> : vector<16xf32>
    %77 = vector.multi_reduction <maximumf>, %76, %cst_26 [1] : vector<16x16xf32> to vector<16xf32>
    %78 = vector.shape_cast %77 : vector<16xf32> to vector<16x1xf32>
    %79 = vector.broadcast %78 : vector<16x1xf32> to vector<16x16xf32>
    %80 = arith.subf %76, %79 : vector<16x16xf32>
    %81 = math.exp %80 : vector<16x16xf32>
    %cst_27 = arith.constant dense<0.000000e+00> : vector<16xf32>
    %82 = vector.multi_reduction <add>, %81, %cst_27 [1] : vector<16x16xf32> to vector<16xf32>
    %83 = vector.shape_cast %82 : vector<16xf32> to vector<16x1xf32>
    %84 = tpu.reciprocal %83 {approx = true} : vector<16x1xf32> -> vector<16x1xf32>
    %85 = vector.broadcast %84 : vector<16x1xf32> to vector<16x16xf32>
    %86 = arith.mulf %81, %85 : vector<16x16xf32>
    %87 = arith.truncf %86 : vector<16x16xf32> to vector<16x16xbf16>
    %cst_28 = arith.constant dense<0.000000e+00> : vector<16x32xf32>
    %88 = tpu.matmul %87, %73, %cst_28 {dimension_numbers = #tpu.dot_dimension_numbers<[1], [0], [0], [1], [0, 0, 1, 1], [], []>} : vector<16x16xbf16>, vector<16x32xbf16>, vector<16x32xf32> -> vector<16x32xf32>
    %89 = arith.addf %66, %88 : vector<16x32xf32>
    %c10 = arith.constant 10 : index
    %c0_29 = arith.constant 0 : index
    %90 = vector.load %arg2[%c10, %c0_29] : memref<32x128xf32, #tpu.memory_space<vmem>>, vector<1x32xf32>
    %91 = vector.broadcast %90 : vector<1x32xf32> to vector<16x32xf32>
    %92 = arith.mulf %40, %91 : vector<16x32xf32>
    %93 = arith.truncf %92 : vector<16x32xf32> to vector<16x32xbf16>
    %94 = vector.broadcast %90 : vector<1x32xf32> to vector<16x32xf32>
    %95 = arith.mulf %41, %94 : vector<16x32xf32>
    %96 = arith.truncf %95 : vector<16x32xf32> to vector<16x32xbf16>
    %97 = tpu.transpose %93, [1, 0] : vector<16x32xbf16> -> vector<32x16xbf16>
    %cst_30 = arith.constant dense<0.000000e+00> : vector<16x16xf32>
    %98 = tpu.matmul %42, %97, %cst_30 {dimension_numbers = #tpu.dot_dimension_numbers<[1], [0], [0], [1], [0, 0, 1, 1], [], []>} : vector<16x32xbf16>, vector<32x16xbf16>, vector<16x16xf32> -> vector<16x16xf32>
    %99 = arith.addf %98, %9 : vector<16x16xf32>
    %cst_31 = arith.constant dense<0xFF800000> : vector<16xf32>
    %100 = vector.multi_reduction <maximumf>, %99, %cst_31 [1] : vector<16x16xf32> to vector<16xf32>
    %101 = vector.shape_cast %100 : vector<16xf32> to vector<16x1xf32>
    %102 = vector.broadcast %101 : vector<16x1xf32> to vector<16x16xf32>
    %103 = arith.subf %99, %102 : vector<16x16xf32>
    %104 = math.exp %103 : vector<16x16xf32>
    %cst_32 = arith.constant dense<0.000000e+00> : vector<16xf32>
    %105 = vector.multi_reduction <add>, %104, %cst_32 [1] : vector<16x16xf32> to vector<16xf32>
    %106 = vector.shape_cast %105 : vector<16xf32> to vector<16x1xf32>
    %107 = tpu.reciprocal %106 {approx = true} : vector<16x1xf32> -> vector<16x1xf32>
    %108 = vector.broadcast %107 : vector<16x1xf32> to vector<16x16xf32>
    %109 = arith.mulf %104, %108 : vector<16x16xf32>
    %110 = arith.truncf %109 : vector<16x16xf32> to vector<16x16xbf16>
    %cst_33 = arith.constant dense<0.000000e+00> : vector<16x32xf32>
    %111 = tpu.matmul %110, %96, %cst_33 {dimension_numbers = #tpu.dot_dimension_numbers<[1], [0], [0], [1], [0, 0, 1, 1], [], []>} : vector<16x16xbf16>, vector<16x32xbf16>, vector<16x32xf32> -> vector<16x32xf32>
    %112 = arith.addf %89, %111 : vector<16x32xf32>
    %c11 = arith.constant 11 : index
    %c0_34 = arith.constant 0 : index
    %113 = vector.load %arg2[%c11, %c0_34] : memref<32x128xf32, #tpu.memory_space<vmem>>, vector<1x32xf32>
    %114 = vector.broadcast %113 : vector<1x32xf32> to vector<16x32xf32>
    %115 = arith.mulf %40, %114 : vector<16x32xf32>
    %116 = arith.truncf %115 : vector<16x32xf32> to vector<16x32xbf16>
    %117 = vector.broadcast %113 : vector<1x32xf32> to vector<16x32xf32>
    %118 = arith.mulf %41, %117 : vector<16x32xf32>
    %119 = arith.truncf %118 : vector<16x32xf32> to vector<16x32xbf16>
    %120 = tpu.transpose %116, [1, 0] : vector<16x32xbf16> -> vector<32x16xbf16>
    %cst_35 = arith.constant dense<0.000000e+00> : vector<16x16xf32>
    %121 = tpu.matmul %42, %120, %cst_35 {dimension_numbers = #tpu.dot_dimension_numbers<[1], [0], [0], [1], [0, 0, 1, 1], [], []>} : vector<16x32xbf16>, vector<32x16xbf16>, vector<16x16xf32> -> vector<16x16xf32>
    %122 = arith.addf %121, %9 : vector<16x16xf32>
    %cst_36 = arith.constant dense<0xFF800000> : vector<16xf32>
    %123 = vector.multi_reduction <maximumf>, %122, %cst_36 [1] : vector<16x16xf32> to vector<16xf32>
    %124 = vector.shape_cast %123 : vector<16xf32> to vector<16x1xf32>
    %125 = vector.broadcast %124 : vector<16x1xf32> to vector<16x16xf32>
    %126 = arith.subf %122, %125 : vector<16x16xf32>
    %127 = math.exp %126 : vector<16x16xf32>
    %cst_37 = arith.constant dense<0.000000e+00> : vector<16xf32>
    %128 = vector.multi_reduction <add>, %127, %cst_37 [1] : vector<16x16xf32> to vector<16xf32>
    %129 = vector.shape_cast %128 : vector<16xf32> to vector<16x1xf32>
    %130 = tpu.reciprocal %129 {approx = true} : vector<16x1xf32> -> vector<16x1xf32>
    %131 = vector.broadcast %130 : vector<16x1xf32> to vector<16x16xf32>
    %132 = arith.mulf %127, %131 : vector<16x16xf32>
    %133 = arith.truncf %132 : vector<16x16xf32> to vector<16x16xbf16>
    %cst_38 = arith.constant dense<0.000000e+00> : vector<16x32xf32>
    %134 = tpu.matmul %133, %119, %cst_38 {dimension_numbers = #tpu.dot_dimension_numbers<[1], [0], [0], [1], [0, 0, 1, 1], [], []>} : vector<16x16xbf16>, vector<16x32xbf16>, vector<16x32xf32> -> vector<16x32xf32>
    %135 = arith.addf %112, %134 : vector<16x32xf32>
    %c64 = arith.constant 64 : index
    %c0_39 = arith.constant 0 : index
    %136 = vector.load %arg1[%c64, %c0_39] : memref<224x128xbf16, #tpu.memory_space<vmem>>, vector<32x32xbf16>
    %137 = arith.truncf %135 : vector<16x32xf32> to vector<16x32xbf16>
    %cst_40 = arith.constant dense<0.000000e+00> : vector<16x32xf32>
    %138 = tpu.matmul %137, %136, %cst_40 {dimension_numbers = #tpu.dot_dimension_numbers<[1], [0], [0], [1], [0, 0, 1, 1], [], []>} : vector<16x32xbf16>, vector<32x32xbf16>, vector<16x32xf32> -> vector<16x32xf32>
    %139 = vector.broadcast %6 : vector<1x32xf32> to vector<16x32xf32>
    %140 = arith.addf %138, %139 : vector<16x32xf32>
    %141 = arith.addf %0, %140 : vector<16x32xf32>
    %cst_41 = arith.constant dense<0.000000e+00> : vector<16xf32>
    %142 = vector.multi_reduction <add>, %141, %cst_41 [1] : vector<16x32xf32> to vector<16xf32>
    %143 = vector.shape_cast %142 : vector<16xf32> to vector<16x1xf32>
    %cst_42 = arith.constant 3.200000e+01 : f32
    %144 = vector.broadcast %cst_42 : f32 to vector<16x1xf32>
    %145 = arith.divf %143, %144 : vector<16x1xf32>
    %146 = vector.broadcast %145 : vector<16x1xf32> to vector<16x32xf32>
    %147 = arith.subf %141, %146 : vector<16x32xf32>
    %148 = vector.broadcast %145 : vector<16x1xf32> to vector<16x32xf32>
    %149 = arith.subf %141, %148 : vector<16x32xf32>
    %150 = arith.mulf %147, %149 : vector<16x32xf32>
    %cst_43 = arith.constant dense<0.000000e+00> : vector<16xf32>
    %151 = vector.multi_reduction <add>, %150, %cst_43 [1] : vector<16x32xf32> to vector<16xf32>
    %152 = vector.shape_cast %151 : vector<16xf32> to vector<16x1xf32>
    %cst_44 = arith.constant 3.200000e+01 : f32
    %153 = vector.broadcast %cst_44 : f32 to vector<16x1xf32>
    %154 = arith.divf %152, %153 : vector<16x1xf32>
    %155 = vector.broadcast %145 : vector<16x1xf32> to vector<16x32xf32>
    %156 = arith.subf %141, %155 : vector<16x32xf32>
    %cst_45 = arith.constant 9.99999974E-6 : f32
    %157 = vector.broadcast %cst_45 : f32 to vector<16x1xf32>
    %158 = arith.addf %154, %157 : vector<16x1xf32>
    %159 = math.rsqrt %158 : vector<16x1xf32>
    %160 = vector.broadcast %159 : vector<16x1xf32> to vector<16x32xf32>
    %161 = arith.mulf %156, %160 : vector<16x32xf32>
    %162 = vector.broadcast %3 : vector<1x32xf32> to vector<16x32xf32>
    %163 = arith.mulf %161, %162 : vector<16x32xf32>
    %164 = vector.broadcast %4 : vector<1x32xf32> to vector<16x32xf32>
    %165 = arith.addf %163, %164 : vector<16x32xf32>
    %c32 = arith.constant 32 : index
    %c0_46 = arith.constant 0 : index
    %166 = vector.load %arg1[%c32, %c0_46] : memref<224x128xbf16, #tpu.memory_space<vmem>>, vector<32x128xbf16>
    %167 = arith.truncf %165 : vector<16x32xf32> to vector<16x32xbf16>
    %cst_47 = arith.constant dense<0.000000e+00> : vector<16x128xf32>
    %168 = tpu.matmul %167, %166, %cst_47 {dimension_numbers = #tpu.dot_dimension_numbers<[1], [0], [0], [1], [0, 0, 1, 1], [], []>} : vector<16x32xbf16>, vector<32x128xbf16>, vector<16x128xf32> -> vector<16x128xf32>
    %169 = vector.broadcast %7 : vector<1x128xf32> to vector<16x128xf32>
    %170 = arith.addf %168, %169 : vector<16x128xf32>
    %cst_48 = arith.constant 5.000000e-01 : f32
    %171 = vector.broadcast %cst_48 : f32 to vector<16x128xf32>
    %172 = arith.mulf %171, %170 : vector<16x128xf32>
    %cst_49 = arith.constant 4.471500e-02 : f32
    %173 = vector.broadcast %cst_49 : f32 to vector<16x128xf32>
    %174 = arith.mulf %173, %170 : vector<16x128xf32>
    %175 = arith.mulf %174, %170 : vector<16x128xf32>
    %176 = arith.mulf %175, %170 : vector<16x128xf32>
    %177 = arith.addf %170, %176 : vector<16x128xf32>
    %cst_50 = arith.constant 0.797884583 : f32
    %178 = vector.broadcast %cst_50 : f32 to vector<16x128xf32>
    %179 = arith.mulf %178, %177 : vector<16x128xf32>
    %180 = math.tanh %179 : vector<16x128xf32>
    %cst_51 = arith.constant 1.000000e+00 : f32
    %181 = vector.broadcast %cst_51 : f32 to vector<16x128xf32>
    %182 = arith.addf %181, %180 : vector<16x128xf32>
    %183 = arith.mulf %172, %182 : vector<16x128xf32>
    %c96 = arith.constant 96 : index
    %c0_52 = arith.constant 0 : index
    %184 = vector.load %arg1[%c96, %c0_52] : memref<224x128xbf16, #tpu.memory_space<vmem>>, vector<128x32xbf16>
    %185 = arith.truncf %183 : vector<16x128xf32> to vector<16x128xbf16>
    %cst_53 = arith.constant dense<0.000000e+00> : vector<16x32xf32>
    %186 = tpu.matmul %185, %184, %cst_53 {dimension_numbers = #tpu.dot_dimension_numbers<[1], [0], [0], [1], [0, 0, 1, 1], [], []>} : vector<16x128xbf16>, vector<128x32xbf16>, vector<16x32xf32> -> vector<16x32xf32>
    %187 = vector.broadcast %8 : vector<1x32xf32> to vector<16x32xf32>
    %188 = arith.addf %186, %187 : vector<16x32xf32>
    %189 = arith.addf %141, %188 : vector<16x32xf32>
    %c0_54 = arith.constant 0 : index
    %c0_55 = arith.constant 0 : index
    %190 = vector.load %arg3[%c0_54, %c0_55] : memref<16x32xf32, #tpu.memory_space<vmem>>, vector<16x32xf32>
    tpu.vector_store %arg3[%c0_54, %c0_55], %189 {strides = array<i32>} : memref<16x32xf32, #tpu.memory_space<vmem>>, vector<16x32xf32>,
    return
  }
}

</mosaic_0001>

<bundles_post_ra>
// kernel: tpu_custom_call.1
= control target key start
LH: loop header
LB: loop body
LE: loop exit
PB: predicated region body
PF: predicated region fallthrough
CT: control target
= control target key end

     0   :  { %8 = vsyncpa [#allocation3], 0  ;;  %s1666_s0 = inlined_call_operand.hbm [shape: f32[16,32], index: 0, kind: input, shape index: {}]   ;;  %s1667_s1 = inlined_call_operand.hbm [shape: bf16[224,128], index: 1, kind: input, shape index: {}]   ;;  %s1668_s2 = inlined_call_operand.hbm [shape: f32[32,128], index: 2, kind: input, shape index: {}]   ;;  %s1669_s3 = inlined_call_operand.hbm [shape: f32[16,32], index: 3, kind: output, shape index: {}]  }
   0x1   :  { %9 = vsyncpa [#allocation6], 0 }
   0x2   :  { %10 = vsyncpa [#allocation4], 0  ;;  %s1386_s12 = smov [#allocation5]   ;;  %s1292_s16 = scalar_lea.hbm %s1667_s1, 1792 }
   0x3   :  { %s28_s13 = sshll.u32 %s1386_s12, 4  ;;  %p1293_p0 = scmp.ne.s32.totalorder %s1667_s1, %s1292_s16  ;;  %s29_s13 = int_to_ptr.vmem [resolvable:$true] %s28_s13 }
   0x4   :  { %p1296_p1 = scmp.lt.u32.totalorder %s1292_s16, %s1667_s1 }
   0x6   :  { %p1298_p2 = pnand %p1296_p1, %p1293_p0 }
   0x8   :  { %1301 = shalt.err (!%p1298_p2)
}
   0x9   :  { %s1302_s21 = scalar_lea.vmem %s29_s13, 1792  ;;  %p1307_p4 = scmp.lt.s32.totalorder %s29_s13, %s29_s13 }
   0xa   :  { %p1303_p3 = scmp.ne.s32.totalorder %s29_s13, %s1302_s21  ;;  %p1308_p5 = scmp.lt.s32.totalorder %s1302_s21, %s1302_s21 }
   0xc   :  { %p1309_p6 = por %p1308_p5, %p1307_p4 }
   0xe   :  { %p1310_p7 = pnand %p1309_p6, %p1303_p3 }
  0x10   :  { %1313 = shalt.err (!%p1310_p7)
}
  0x11   :  { %s1387_s22 = smov 64   ;;  %s1388_s23 = smov 4  }
  0x12   :  { %34 = dma.hbm_to_vmem [thread:$0]  %s1667_s1, 1792, %s29_s13, [#allocation6], %s1387_s22, %s1387_s22, %s1388_s23  }
  0x13   :  { %s1389_s26 = smov [#allocation2]   ;;  %s1314_s30 = scalar_lea.hbm %s1666_s0, 256 }
  0x14   :  { %s16_s27 = sshll.u32 %s1389_s26, 4  ;;  %p1315_p8 = scmp.ne.s32.totalorder %s1666_s0, %s1314_s30  ;;  %s17_s27 = int_to_ptr.vmem [resolvable:$true] %s16_s27 }
  0x15   :  { %p1318_p9 = scmp.lt.u32.totalorder %s1314_s30, %s1666_s0 }
  0x17   :  { %p1320_p10 = pnand %p1318_p9, %p1315_p8 }
  0x19   :  { %1323 = shalt.err (!%p1320_p10)
}
  0x1a   :  { %s1324_s8 = scalar_lea.vmem %s17_s27, 256  ;;  %p1329_p12 = scmp.lt.s32.totalorder %s17_s27, %s17_s27 }
  0x1b   :  { %p1325_p11 = scmp.ne.s32.totalorder %s17_s27, %s1324_s8  ;;  %p1330_p13 = scmp.lt.s32.totalorder %s1324_s8, %s1324_s8 }
  0x1d   :  { %p1331_p0 = por %p1330_p13, %p1329_p12 }
  0x1f   :  { %p1332_p1 = pnand %p1331_p0, %p1325_p11 }
  0x21   :  { %1335 = shalt.err (!%p1332_p1)
}
  0x22   :  { %s1390_s1 = smov 128   ;;  %s1391_s9 = smov 8  }
  0x23   :  { %22 = dma.hbm_to_vmem [thread:$0]  %s1666_s0, 256, %s17_s27, [#allocation3], %s1390_s1, %s1390_s1, %s1391_s9  }
  0x24   :  { %s1392_s12 = smov [#allocation7]   ;;  %s1336_s16 = scalar_lea.hbm %s1668_s2, 512 }
  0x25   :  { %s40_s13 = sshll.u32 %s1392_s12, 4  ;;  %p1337_p2 = scmp.ne.s32.totalorder %s1668_s2, %s1336_s16  ;;  %s41_s13 = int_to_ptr.vmem [resolvable:$true] %s40_s13 }
  0x26   :  { %p1340_p3 = scmp.lt.u32.totalorder %s1336_s16, %s1668_s2 }
  0x28   :  { %p1342_p4 = pnand %p1340_p3, %p1337_p2 }
  0x2a   :  { %1345 = shalt.err (!%p1342_p4)
}
  0x2b   :  { %s1346_s21 = scalar_lea.vmem %s41_s13, 512  ;;  %p1351_p6 = scmp.lt.s32.totalorder %s41_s13, %s41_s13 }
  0x2c   :  { %p1347_p5 = scmp.ne.s32.totalorder %s41_s13, %s1346_s21  ;;  %p1352_p7 = scmp.lt.s32.totalorder %s1346_s21, %s1346_s21 }
  0x2e   :  { %p1353_p8 = por %p1352_p7, %p1351_p6 }
  0x30   :  { %p1354_p9 = pnand %p1353_p8, %p1347_p5 }
  0x32   :  { %1357 = shalt.err (!%p1354_p9)
}
  0x33   :  { %46 = dma.hbm_to_vmem [thread:$0]  %s1668_s2, 512, %s41_s13, [#allocation6], %s1390_s1, %s1390_s1, %s1391_s9  }
  0x34   :  { %1380 = dma.done.wait [#allocation3], 256  }
  0x35   :  { %1381 = vsyncadd [#allocation3], 4294967040 }
  0x36   :  { %1382 = dma.done.wait [#allocation6], 2304  }
  0x37   :  { %1383 = vsyncadd [#allocation6], 4294964992  ;;  %vm69_vm0 = vcmask 261120   ;;  %v1462_v0 = vld [vmem:[#allocation2] sm:$0xff]  ;;  %v1464_v1 = vld [vmem:[#allocation2 + $0x8] sm:$0xff]  ;;  %v1393_v15 = vmov 0.0  }
  0x38   :  { %v70_v2 = vsel %vm69_vm0, %v1462_v0, 0.0  ;;  %v73_v3 = vsel %vm69_vm0, %v1464_v1, 0.0  ;;  %v1234_v14 = vld [vmem:[#allocation5] sm:$0xff]   ;;  %1118 = vmatprep.subr.bf16.mxu0 %v1393_v15  ;;  %1138 = vmatprep.subr.bf16.mxu1 %v1393_v15  ;;  %v1235_v16 = vld [vmem:[#allocation5 + $0x8] sm:$0xff]   ;;  %vm1394_vm1 = vmmov 0   ;;  %s1395_s2 = smov 32  }
  0x39   :  { %71 = vadd.xlane.f32.xlu0 %v70_v2  ;;  %1119 = vmatpush3.bf16.msra.mxu0 %v1234_v14  ;;  %v1482_v17 = vld [vmem:[#allocation7 + $0x9] ss:$0 sm:$0xff]  ;;  %v1053_v18 = vld [vmem:[#allocation7 + $0x8] ss:$0 sm:$0xff]  ;;  %v1485_v19 = vld [vmem:[#allocation7 + $0xa] ss:$0 sm:$0xff] }
  0x3a   :  { %1122 = vmatprep.mubr.msk.bf16.mxu0 %vm1394_vm1, %v1393_v15  ;;  %1120 = vmatprep.subr.bf16.mxu0 %v1393_v15  ;;  %v1488_v20 = vld [vmem:[#allocation7 + $0xb] ss:$0 sm:$0xff]  ;;  %v1047_v29 = vld [vmem:[#allocation7] ss:$0 sm:$0xff]  ;;  %v1048_v33 = vld [vmem:[#allocation7 + $0x1] ss:$0 sm:$0xff] }
  0x3b   :  { %1140 = vmatprep.mubr.msk.bf16.mxu1 %vm1394_vm1, %v1393_v15  ;;  %v1049_v39 = vld [vmem:[#allocation7 + $0x4] ss:$0 sm:$0xff]  ;;  %s1396_s24 = smov 96   ;;  %vm243_vm2 = vcmask 130048  }
  0x3d   :  { %74 = vadd.xlane.f32.xlu0 %v73_v3  ;;  %1121 = vmatpush3.bf16.msra.mxu0 %v1235_v16 }
  0x3e   :  { %1126 = vmatprep.subr.bf16.mxu0 %v1393_v15 }
  0x53   :  { %181 = vrot.lane.b32.xlu0 %v1053_v18, %s1395_s2 }
  0xc6   :  { %v72_v4 = vpop.xlane.xlu0 %71 }
  0xc7   :  { %v77_v5 = vmul.f32 0.03125, %v72_v4 }
  0xc9   :  { %v79_v6 = vsub.f32 %v1462_v0, %v77_v5 }
  0xca   :  { %v75_v7 = vpop.xlane.xlu0 %74 }
  0xcb   :  { %v78_v8 = vmul.f32 0.03125, %v75_v7  ;;  %v81_v9 = vmul.f32 %v79_v6, %v79_v6 }
  0xcd   :  { %v80_v10 = vsub.f32 %v1464_v1, %v78_v8  ;;  %v83_v11 = vsel %vm69_vm0, %v81_v9, 0.0  ;;  %v67_v8 = vld [vmem:[#allocation7 + $0x10] sm:$0xff] }
  0xce   :  { %84 = vadd.xlane.f32.xlu1 %v83_v11  ;;  %v182_v45 = vpop.permute.xlu0 %181 }
  0xcf   :  { %v82_v12 = vmul.f32 %v80_v10, %v80_v10 }
  0xd1   :  { %v86_v13 = vsel %vm69_vm0, %v82_v12, 0.0 }
  0xd2   :  { %87 = vadd.xlane.f32.xlu1 %v86_v13 }
  0xe3   :  { %273 = vrot.lane.b32.xlu1 %v1482_v17, %s1395_s2 }
  0xe7   :  { %457 = vrot.lane.b32.xlu1 %v1485_v19, %s1395_s2 }
  0xeb   :  { %595 = vrot.lane.b32.xlu1 %v1488_v20, %s1395_s2 }
 0x15b   :  { %v85_v21 = vpop.xlane.xlu1 %84 }
 0x15c   :  { %v89_v22 = vmul.f32 0.03125, %v85_v21 }
 0x15e   :  { %v91_v23 = vadd.f32 1e-05, %v89_v22 }
 0x15f   :  { %v88_v24 = vpop.xlane.xlu1 %87 }
 0x160   :  { %1248 = vrsqrt.f32 %v91_v23  ;;  %v90_v25 = vmul.f32 0.03125, %v88_v24 }
 0x162   :  { %v92_v26 = vadd.f32 1e-05, %v90_v25 }
 0x163   :  { %v274_v38 = vpop.permute.xlu1 %273 }
 0x164   :  { %1250 = vrsqrt.f32 %v92_v26 }
 0x167   :  { %v458_v40 = vpop.permute.xlu1 %457 }
 0x16a   :  { %v1249_v27 = vpop.eup %1248 }
 0x16b   :  { %v95_v28 = vmul.f32 %v1249_v27, %v79_v6  ;;  %v596_v52 = vpop.permute.xlu1 %595 }
 0x16d   :  { %v101_v32 = vmul.f32 %v1047_v29, %v95_v28 }
 0x16e   :  { %v1251_v30 = vpop.eup %1250 }
 0x16f   :  { %v96_v31 = vmul.f32 %v1251_v30, %v80_v10  ;;  %v107_v35 = vadd.f32 %v1048_v33, %v101_v32  ;;  %v68_v10 = vld [vmem:[#allocation7 + $0x18] sm:$0xff] }
 0x171   :  { %v102_v34 = vmul.f32 %v1047_v29, %v96_v31 }
 0x173   :  { %v108_v36 = vadd.f32 %v1048_v33, %v102_v34 }
 0x175   :  { %v109_v37 = vpack.c.bf16 %v108_v36, %v107_v35 }
 0x177   :  { %1123 = vmatmul.mubr.msk.bf16.vlgmr.msra.gmra.mrb[0].mxu0 %vm69_vm0, %v109_v37 }
 0x178   :  { %1128 = vmatprep.mubr.msk.bf16.mxu0 %vm1394_vm1, %v1393_v15 }
 0x24a   :  { %v167_v41 = vpop.f32.mrb[0].mxu0 }
 0x24b   :  { %v1494_v42 = vadd.f32 %v1049_v39, %v167_v41  ;;  %v1124_v43 = vpop.f32.mrb[1].mxu0 }
 0x24c   :  { %v170_v44 = vpop.f32.mrb[2].mxu0 }
 0x24d   :  { %v1496_v46 = vadd.f32 %v1049_v39, %v170_v44  ;;  %v1125_v47 = vpop.f32.mrb[3].mxu0  ;;  %v184_v48 = vmul.f32 %v182_v45, %v1494_v42  ;;  %v276_v50 = vmul.f32 %v274_v38, %v1494_v42  ;;  %v598_v57 = vmul.f32 %v596_v52, %v1494_v42 }
 0x24e   :  { %v460_v58 = vmul.f32 %v458_v40, %v1494_v42 }
 0x24f   :  { %v185_v49 = vmul.f32 %v182_v45, %v1496_v46  ;;  %v277_v51 = vmul.f32 %v274_v38, %v1496_v46  ;;  %v599_v53 = vmul.f32 %v596_v52, %v1496_v46  ;;  %v461_v56 = vmul.f32 %v458_v40, %v1496_v46 }
 0x250   :  { %v174_v2 = vpack.c.bf16 %v1496_v46, %v1494_v42 }
 0x251   :  { %v186_v54 = vpack.c.bf16 %v185_v49, %v184_v48  ;;  %v278_v55 = vpack.c.bf16 %v277_v51, %v276_v50  ;;  %v600_v59 = vpack.c.bf16 %v599_v53, %v598_v57  ;;  %v462_v60 = vpack.c.bf16 %v461_v56, %v460_v58 }
 0x253   :  { %286 = vrot.lane.b32.xlu1 %v278_v55, %s1396_s24  ;;  %194 = vrot.lane.b32.xlu0 %v186_v54, %s1396_s24 }
 0x257   :  { %608 = vrot.lane.b32.xlu1 %v600_v59, %s1396_s24  ;;  %470 = vrot.lane.b32.xlu0 %v462_v60, %s1396_s24 }
 0x25b   :  { %187 = vrot.lane.b32.xlu1 %v1053_v18, %s1387_s22 }
 0x2c5   :  { %v195_v61 = vpop.permute.xlu0 %194  ;;  %v287_v63 = vpop.permute.xlu1 %286 }
 0x2c6   :  { %v200_v62 = vsel %vm69_vm0, %v195_v61, 0  ;;  %v289_v3 = vsel %vm69_vm0, %v287_v63, 0 }
 0x2c7   :  { %1127 = vmatpush3.bf16.xpose.msra.mxu0 %v200_v62 }
 0x2c8   :  { %1132 = vmatprep.subr.bf16.mxu0 %v1393_v15 }
 0x2c9   :  { %v471_v4 = vpop.permute.xlu0 %470  ;;  %v609_v6 = vpop.permute.xlu1 %608 }
 0x2ca   :  { %v473_v5 = vsel %vm69_vm0, %v471_v4, 0  ;;  %v611_v7 = vsel %vm69_vm0, %v609_v6, 0 }
 0x2cd   :  { %v188_v51 = vpop.permute.xlu1 %187 }
 0x2ce   :  { %1129 = vmatmul.mubr.msk.bf16.vlgmr.msra.gmra.mrb[4].mxu0 %vm69_vm0, %v174_v2 }
 0x2cf   :  { %1133 = vmatpush3.bf16.xpose.msra.mxu0 %v289_v3  ;;  %1134 = vmatprep.mubr.msk.bf16.mxu0 %vm1394_vm1, %v1393_v15 }
 0x2d0   :  { %1150 = vmatprep.subr.bf16.mxu0 %v1393_v15 }
 0x2d6   :  { %1135 = vmatmul.mubr.msk.bf16.vlgmr.msra.gmra.mrb[8].mxu0 %vm69_vm0, %v174_v2 }
 0x2d7   :  { %1151 = vmatpush3.bf16.xpose.msra.mxu0 %v473_v5  ;;  %1152 = vmatprep.mubr.msk.bf16.mxu0 %vm1394_vm1, %v1393_v15 }
 0x2d8   :  { %1162 = vmatprep.subr.bf16.mxu0 %v1393_v15 }
 0x2de   :  { %1153 = vmatmul.mubr.msk.bf16.vlgmr.msra.gmra.mrb[12].mxu0 %vm69_vm0, %v174_v2 }
 0x2df   :  { %1163 = vmatpush3.bf16.xpose.msra.mxu0 %v611_v7  ;;  %1164 = vmatprep.mubr.msk.bf16.mxu0 %vm1394_vm1, %v1393_v15 }
 0x2e0   :  { %1174 = vmatprep.subr.bf16.mxu0 %v1393_v15 }
 0x2e6   :  { %1165 = vmatmul.mubr.msk.bf16.vlgmr.msra.gmra.mrb[16].mxu0 %vm69_vm0, %v174_v2 }
 0x2e7   :  { %1178 = vmatprep.mubr.msk.bf16.mxu0 %vm1394_vm1, %v1393_v15 }
 0x3a1   :  { %v236_v9 = vpop.f32.mrb[4].mxu0 }
 0x3a2   :  { %v237_v11 = vadd.f32 %v236_v9, %v67_v8  ;;  %v1130_v12 = vpop.f32.mrb[5].mxu0  ;;  %v191_v9 = vmul.f32 %v188_v51, %v1496_v46 }
 0x3a3   :  { %v239_v13 = vpop.f32.mrb[6].mxu0 }
 0x3a4   :  { %v240_v14 = vadd.f32 %v239_v13, %v68_v10  ;;  %v1131_v16 = vpop.f32.mrb[7].mxu0  ;;  %v244_v18 = vsel %vm243_vm2, %v237_v11, -inf }
 0x3a5   :  { %245 = vmax.xlane.f32.xlu0 %v244_v18 }
 0x3a6   :  { %v247_v21 = vsel %vm243_vm2, %v240_v14, -inf }
 0x3a9   :  { %248 = vmax.xlane.f32.xlu0 %v247_v21  ;;  %v325_v22 = vpop.f32.mrb[8].mxu0 }
 0x3aa   :  { %v326_v23 = vadd.f32 %v325_v22, %v67_v8  ;;  %v1136_v24 = vpop.f32.mrb[9].mxu0 }
 0x3ab   :  { %v328_v25 = vpop.f32.mrb[10].mxu0 }
 0x3ac   :  { %v329_v26 = vadd.f32 %v328_v25, %v68_v10  ;;  %v1137_v27 = vpop.f32.mrb[11].mxu0  ;;  %v332_v28 = vsel %vm243_vm2, %v326_v23, -inf }
 0x3ad   :  { %333 = vmax.xlane.f32.xlu0 %v332_v28 }
 0x3ae   :  { %v335_v29 = vsel %vm243_vm2, %v329_v26, -inf }
 0x3af   :  { %336 = vmax.xlane.f32.xlu1 %v335_v29 }
 0x3b1   :  { %v509_v30 = vpop.f32.mrb[12].mxu0 }
 0x3b2   :  { %v1154_v31 = vpop.f32.mrb[13].mxu0  ;;  %v510_v43 = vadd.f32 %v509_v30, %v67_v8 }
 0x3b3   :  { %v512_v32 = vpop.f32.mrb[14].mxu0 }
 0x3b4   :  { %v513_v33 = vadd.f32 %v512_v32, %v68_v10  ;;  %v1155_v34 = vpop.f32.mrb[15].mxu0  ;;  %v516_v44 = vsel %vm243_vm2, %v510_v43, -inf }
 0x3b6   :  { %v519_v35 = vsel %vm243_vm2, %v513_v33, -inf }
 0x3b7   :  { %520 = vmax.xlane.f32.xlu1 %v519_v35 }
 0x3b9   :  { %v647_v36 = vpop.f32.mrb[16].mxu0 }
 0x3ba   :  { %v1534_v37 = vadd.f32 %v647_v36, %v67_v8  ;;  %v1166_v38 = vpop.f32.mrb[17].mxu0  ;;  %v190_v8 = vmul.f32 %v188_v51, %v1494_v42 }
 0x3bb   :  { %v650_v39 = vpop.f32.mrb[18].mxu0 }
 0x3bc   :  { %v1536_v40 = vadd.f32 %v650_v39, %v68_v10  ;;  %v1167_v41 = vpop.f32.mrb[19].mxu0  ;;  %v654_v45 = vsel %vm243_vm2, %v1534_v37, -inf  ;;  %v192_v10 = vpack.c.bf16 %v191_v9, %v190_v8 }
 0x3be   :  { %v657_v47 = vsel %vm243_vm2, %v1536_v40, -inf }
 0x3c3   :  { %279 = vrot.lane.b32.xlu0 %v1482_v17, %s1387_s22 }
 0x3c8   :  { %463 = vrot.lane.b32.xlu1 %v1485_v19, %s1387_s22 }
 0x3e2   :  { %517 = vmax.xlane.f32.xlu0 %v516_v44  ;;  %v1236_v44 = vld [vmem:[#allocation5 + $0x20] sm:$0xff]  }
 0x3e3   :  { %1175 = vmatpush3.bf16.msra.mxu0 %v1236_v44 }
 0x3e4   :  { %1176 = vmatprep.subr.bf16.mxu0 %v1393_v15 }
 0x3e6   :  { %655 = vmax.xlane.f32.xlu0 %v654_v45 }
 0x3ec   :  { %658 = vmax.xlane.f32.xlu1 %v657_v47 }
 0x3fc   :  { %601 = vrot.lane.b32.xlu0 %v1488_v20, %s1387_s22 }
 0x432   :  { %v246_v48 = vpop.xlane.xlu0 %245 }
 0x433   :  { %v250_v17 = vsub.f32 %v237_v11, %v246_v48 }
 0x435   :  { %v252_v49 = vmul.f32 1.442695, %v250_v17 }
 0x436   :  { %v249_v50 = vpop.xlane.xlu0 %248 }
 0x437   :  { %1252 = vpow2.f32 %v252_v49  ;;  %v251_v19 = vsub.f32 %v240_v14, %v249_v50 }
 0x439   :  { %v254_v52 = vmul.f32 1.442695, %v251_v19 }
 0x43a   :  { %v334_v53 = vpop.xlane.xlu0 %333 }
 0x43b   :  { %1254 = vpow2.f32 %v254_v52  ;;  %v338_v54 = vsub.f32 %v326_v23, %v334_v53 }
 0x43c   :  { %v337_v55 = vpop.xlane.xlu1 %336 }
 0x43d   :  { %v340_v56 = vmul.f32 1.442695, %v338_v54  ;;  %v339_v57 = vsub.f32 %v329_v26, %v337_v55 }
 0x43e   :  { %v280_v4 = vpop.permute.xlu0 %279 }
 0x43f   :  { %1256 = vpow2.f32 %v340_v56  ;;  %v342_v58 = vmul.f32 1.442695, %v339_v57  ;;  %v282_v5 = vmul.f32 %v280_v4, %v1494_v42  ;;  %v283_v6 = vmul.f32 %v280_v4, %v1496_v46 }
 0x441   :  { %v1549_v59 = vpop.eup %1252  ;;  %1258 = vpow2.f32 %v342_v58  ;;  %v284_v7 = vpack.c.bf16 %v283_v6, %v282_v5 }
 0x442   :  { %v256_v20 = vsel %vm243_vm2, %v1549_v59, 0.0 }
 0x443   :  { %257 = vadd.xlane.f32.xlu1 %v256_v20 }
 0x444   :  { %v521_v11 = vpop.xlane.xlu1 %520 }
 0x445   :  { %v1553_v60 = vpop.eup %1254  ;;  %v523_v12 = vsub.f32 %v513_v33, %v521_v11  ;;  %v1237_v11 = vld [vmem:[#allocation5 + $0x28] sm:$0xff]  }
 0x446   :  { %v259_v61 = vsel %vm243_vm2, %v1553_v60, 0.0  ;;  %1177 = vmatpush3.bf16.msra.mxu0 %v1237_v11 }
 0x447   :  { %260 = vadd.xlane.f32.xlu1 %v259_v61  ;;  %v526_v16 = vmul.f32 1.442695, %v523_v12  ;;  %1182 = vmatprep.subr.bf16.mxu0 %v1393_v15 }
 0x448   :  { %v464_v23 = vpop.permute.xlu1 %463 }
 0x449   :  { %v1557_v62 = vpop.eup %1256  ;;  %v466_v39 = vmul.f32 %v464_v23, %v1494_v42 }
 0x44a   :  { %v344_v63 = vsel %vm243_vm2, %v1557_v62, 0.0 }
 0x44b   :  { %v1561_v2 = vpop.eup %1258  ;;  %345 = vadd.xlane.f32.xlu1 %v344_v63 }
 0x44c   :  { %v347_v3 = vsel %vm243_vm2, %v1561_v2, 0.0 }
 0x44d   :  { %348 = vadd.xlane.f32.xlu0 %v347_v3 }
 0x45c   :  { %356 = vrot.lane.b32.xlu1 %v284_v7, %s1387_s22 }
 0x463   :  { %404 = vrot.lane.b32.xlu0 %v192_v10, %s1387_s22 }
 0x46f   :  { %v518_v13 = vpop.xlane.xlu0 %517 }
 0x470   :  { %v522_v14 = vsub.f32 %v510_v43, %v518_v13 }
 0x472   :  { %v524_v18 = vmul.f32 1.442695, %v522_v14 }
 0x473   :  { %v656_v21 = vpop.xlane.xlu0 %655 }
 0x474   :  { %1260 = vpow2.f32 %v524_v18  ;;  %v660_v22 = vsub.f32 %v1534_v37, %v656_v21  ;;  %v1065_v21 = vld [vmem:[#allocation7 + $0x5] ss:$0 sm:$0xff] }
 0x475   :  { %1262 = vpow2.f32 %v526_v16 }
 0x476   :  { %v662_v24 = vmul.f32 1.442695, %v660_v22 }
 0x477   :  { %v602_v36 = vpop.permute.xlu0 %601 }
 0x478   :  { %1264 = vpow2.f32 %v662_v24  ;;  %v604_v37 = vmul.f32 %v602_v36, %v1494_v42  ;;  %v605_v38 = vmul.f32 %v602_v36, %v1496_v46 }
 0x479   :  { %v659_v25 = vpop.xlane.xlu1 %658 }
 0x47a   :  { %v661_v26 = vsub.f32 %v1536_v40, %v659_v25  ;;  %v467_v40 = vmul.f32 %v464_v23, %v1496_v46  ;;  %v606_v41 = vpack.c.bf16 %v605_v38, %v604_v37 }
 0x47c   :  { %v664_v27 = vmul.f32 1.442695, %v661_v26  ;;  %v468_v43 = vpack.c.bf16 %v467_v40, %v466_v39  ;;  %v1238_v40 = vld [vmem:[#allocation5 + $0x10] sm:$0xff]  }
 0x47e   :  { %v1573_v28 = vpop.eup %1260  ;;  %1266 = vpow2.f32 %v664_v27 }
 0x47f   :  { %v528_v29 = vsel %vm243_vm2, %v1573_v28, 0.0  ;;  %v1577_v30 = vpop.eup %1262 }
 0x480   :  { %529 = vadd.xlane.f32.xlu1 %v528_v29  ;;  %v531_v32 = vsel %vm243_vm2, %v1577_v30, 0.0 }
 0x482   :  { %v1579_v31 = vpop.eup %1264 }
 0x483   :  { %v666_v33 = vsel %vm243_vm2, %v1579_v31, 0.0 }
 0x484   :  { %532 = vadd.xlane.f32.xlu1 %v531_v32  ;;  %667 = vadd.xlane.f32.xlu0 %v666_v33 }
 0x488   :  { %v1585_v34 = vpop.eup %1266 }
 0x489   :  { %v669_v35 = vsel %vm243_vm2, %v1585_v34, 0.0 }
 0x48a   :  { %670 = vadd.xlane.f32.xlu1 %v669_v35 }
 0x49a   :  { %678 = vrot.lane.b32.xlu0 %v606_v41, %s1387_s22  ;;  %v1239_v41 = vld [vmem:[#allocation5 + $0x18] sm:$0xff]  }
 0x49b   :  { %540 = vrot.lane.b32.xlu1 %v468_v43, %s1387_s22  ;;  %s1397_s22 = smov [#allocation8]  }
 0x49c   :  { %s1034_s25 = sshll.u32 %s1397_s22, 4  ;;  %s1035_s25 = int_to_ptr.vmem [resolvable:$true] %s1034_s25 }
 0x49d   :  { %s1358_s26 = scalar_lea.vmem %s1035_s25, 256  ;;  %p1363_p11 = scmp.lt.s32.totalorder %s1035_s25, %s1035_s25 }
 0x49e   :  { %p1359_p10 = scmp.ne.s32.totalorder %s1035_s25, %s1358_s26  ;;  %p1364_p12 = scmp.lt.s32.totalorder %s1358_s26, %s1358_s26 }
 0x4a0   :  { %p1365_p13 = por %p1364_p12, %p1363_p11 }
 0x4a2   :  { %p1366_p0 = pnand %p1365_p13, %p1359_p10 }
 0x4d0   :  { %v258_v45 = vpop.xlane.xlu1 %257 }
 0x4d4   :  { %v261_v47 = vpop.xlane.xlu1 %260 }
 0x4d8   :  { %v346_v48 = vpop.xlane.xlu1 %345 }
 0x4d9   :  { %1268 = vrcp.f32 %v346_v48 }
 0x4da   :  { %v349_v17 = vpop.xlane.xlu0 %348 }
 0x4db   :  { %1270 = vrcp.f32 %v349_v17 }
 0x4dc   :  { %v357_v49 = vpop.permute.xlu1 %356  ;;  %1272 = vrcp.f32 %v261_v47 }
 0x4dd   :  { %1139 = vmatpush3.bf16.msra.mxu1 %v357_v49  ;;  %1274 = vrcp.f32 %v258_v45 }
 0x4de   :  { %1144 = vmatprep.subr.bf16.mxu1 %v1393_v15  ;;  %v405_v52 = vpop.permute.xlu0 %404 }
 0x4e3   :  { %v1269_v42 = vpop.eup %1268 }
 0x4e4   :  { %v352_v50 = vmul.f32 %v1269_v42, %v1557_v62 }
 0x4e5   :  { %v1271_v46 = vpop.eup %1270 }
 0x4e6   :  { %v353_v19 = vmul.f32 %v1271_v46, %v1561_v2  ;;  %v1273_v53 = vpop.eup %1272  ;;  %v1069_v46 = vld [vmem:[#allocation7 + $0x2] ss:$0 sm:$0xff] }
 0x4e7   :  { %v1275_v54 = vpop.eup %1274  ;;  %v265_v55 = vmul.f32 %v1273_v53, %v1553_v60 }
 0x4e8   :  { %v354_v51 = vpack.c.bf16 %v353_v19, %v352_v50  ;;  %v264_v56 = vmul.f32 %v1275_v54, %v1549_v59 }
 0x4ea   :  { %1141 = vmatmul.mubr.msk.bf16.vlgmr.msra.gmra.mrb[0].mxu1 %vm243_vm2, %v354_v51  ;;  %v266_v57 = vpack.c.bf16 %v265_v55, %v264_v56 }
 0x4eb   :  { %1145 = vmatpush3.bf16.msra.mxu1 %v405_v52  ;;  %1146 = vmatprep.mubr.msk.bf16.mxu1 %vm1394_vm1, %v1393_v15  ;;  %v1070_v52 = vld [vmem:[#allocation7 + $0x3] ss:$0 sm:$0xff] }
 0x4ec   :  { %1156 = vmatprep.subr.bf16.mxu1 %v1393_v15 }
 0x4f6   :  { %1147 = vmatmul.mubr.msk.bf16.vlgmr.msra.gmra.mrb[0].mxu1 %vm243_vm2, %v266_v57  ;;  %v1240_v57 = vld [vmem:[#allocation5 + $0x30] sm:$0xff]  }
 0x4f7   :  { %1158 = vmatprep.mubr.msk.bf16.mxu1 %vm1394_vm1, %v1393_v15 }
 0x50d   :  { %v530_v58 = vpop.xlane.xlu1 %529 }
 0x50e   :  { %1276 = vrcp.f32 %v530_v58  ;;  %v1241_v58 = vld [vmem:[#allocation5 + $0x38] sm:$0xff]  }
 0x511   :  { %v533_v20 = vpop.xlane.xlu1 %532  ;;  %v668_v62 = vpop.xlane.xlu0 %667 }
 0x512   :  { %1278 = vrcp.f32 %v533_v20  ;;  %v1242_v20 = vld [vmem:[#allocation5 + $0x40] sm:$0xff]  }
 0x515   :  { %v679_v5 = vpop.permute.xlu0 %678 }
 0x517   :  { %v671_v61 = vpop.xlane.xlu1 %670 }
 0x518   :  { %v1277_v63 = vpop.eup %1276  ;;  %1280 = vrcp.f32 %v671_v61  ;;  %v1243_v61 = vld [vmem:[#allocation5 + $0x48] sm:$0xff]  }
 0x519   :  { %1282 = vrcp.f32 %v668_v62  ;;  %v536_v59 = vmul.f32 %v1277_v63, %v1573_v28  ;;  %v1244_v62 = vld [vmem:[#allocation5 + $0x50] sm:$0xff]   ;;  %v1245_v63 = vld [vmem:[#allocation5 + $0x58] sm:$0xff]  }
 0x51b   :  { %v541_v2 = vpop.permute.xlu1 %540 }
 0x51c   :  { %v1279_v3 = vpop.eup %1278  ;;  %1157 = vmatpush3.bf16.msra.mxu1 %v541_v2  ;;  %v1246_v2 = vld [vmem:[#allocation5 + $0x60] sm:$0xff]  }
 0x51d   :  { %v537_v60 = vmul.f32 %v1279_v3, %v1577_v30  ;;  %1168 = vmatprep.subr.bf16.mxu1 %v1393_v15  ;;  %v1247_v3 = vld [vmem:[#allocation5 + $0x68] sm:$0xff]  }
 0x51f   :  { %v538_v4 = vpack.c.bf16 %v537_v60, %v536_v59  ;;  %v1071_v59 = vld [vmem:[#allocation7 + $0x6] ss:$0 sm:$0xff] }
 0x521   :  { %1159 = vmatmul.mubr.msk.bf16.vlgmr.msra.gmra.mrb[0].mxu1 %vm243_vm2, %v538_v4 }
 0x522   :  { %1169 = vmatpush3.bf16.msra.mxu1 %v679_v5  ;;  %1170 = vmatprep.mubr.msk.bf16.mxu1 %vm1394_vm1, %v1393_v15  ;;  %v1281_v6 = vpop.eup %1280 }
 0x523   :  { %1190 = vmatprep.subr.bf16.mxu1 %v1393_v15  ;;  %v1283_v7 = vpop.eup %1282  ;;  %v675_v8 = vmul.f32 %v1281_v6, %v1585_v34 }
 0x524   :  { %v674_v9 = vmul.f32 %v1283_v7, %v1579_v31 }
 0x526   :  { %v676_v10 = vpack.c.bf16 %v675_v8, %v674_v9 }
 0x52d   :  { %1171 = vmatmul.mubr.msk.bf16.vlgmr.msra.gmra.mrb[0].mxu1 %vm243_vm2, %v676_v10 }
 0x52e   :  { %1206 = vmatprep.mubr.msk.bf16.mxu1 %vm1394_vm1, %v1393_v15  ;;  %1191 = vmatpush3.bf16.msra.mxu1 %v1240_v57 }
 0x52f   :  { %1192 = vmatprep.subr.bf16.mxu1 %v1393_v15 }
 0x532   :  { %1193 = vmatpush3.bf16.msra.mxu1 %v1241_v58 }
 0x533   :  { %1194 = vmatprep.subr.bf16.mxu1 %v1393_v15 }
 0x536   :  { %1195 = vmatpush3.bf16.msra.mxu1 %v1242_v20 }
 0x537   :  { %1196 = vmatprep.subr.bf16.mxu1 %v1393_v15 }
 0x53a   :  { %1197 = vmatpush3.bf16.msra.mxu1 %v1243_v61 }
 0x53b   :  { %1198 = vmatprep.subr.bf16.mxu1 %v1393_v15 }
 0x53e   :  { %1199 = vmatpush3.bf16.msra.mxu1 %v1244_v62 }
 0x53f   :  { %1200 = vmatprep.subr.bf16.mxu1 %v1393_v15 }
 0x542   :  { %1201 = vmatpush3.bf16.msra.mxu1 %v1245_v63 }
 0x543   :  { %1202 = vmatprep.subr.bf16.mxu1 %v1393_v15 }
 0x546   :  { %1203 = vmatpush3.bf16.msra.mxu1 %v1246_v2 }
 0x547   :  { %1204 = vmatprep.subr.bf16.mxu1 %v1393_v15 }
 0x54a   :  { %1205 = vmatpush3.bf16.msra.mxu1 %v1247_v3 }
 0x600   :  { %v718_v12 = vpop.f32.mrb[0].mxu1 }
 0x601   :  { %v1172_v13 = vpop.f32.mrb[1].mxu1 }
 0x602   :  { %v721_v14 = vpop.f32.mrb[2].mxu1 }
 0x603   :  { %v731_v16 = vpack.c.bf16 %v721_v14, %v718_v12  ;;  %v1173_v18 = vpop.f32.mrb[3].mxu1 }
 0x605   :  { %1179 = vmatmul.mubr.msk.bf16.vlgmr.msra.gmra.mrb[20].mxu0 %vm69_vm0, %v731_v16 }
 0x606   :  { %1186 = vmatprep.mubr.msk.bf16.mxu0 %vm1394_vm1, %v1393_v15  ;;  %1183 = vmatpush3.bf16.msra.mxu0 %v1238_v40 }
 0x607   :  { %1184 = vmatprep.subr.bf16.mxu0 %v1393_v15 }
 0x60a   :  { %1185 = vmatpush3.bf16.msra.mxu0 %v1239_v41 }
 0x6d8   :  { %v785_v22 = vpop.f32.mrb[20].mxu0 }
 0x6d9   :  { %v786_v23 = vadd.f32 %v1065_v21, %v785_v22  ;;  %v1180_v24 = vpop.f32.mrb[21].mxu0 }
 0x6da   :  { %v788_v25 = vpop.f32.mrb[22].mxu0 }
 0x6db   :  { %v1625_v26 = vadd.f32 %v786_v23, %v1462_v0  ;;  %v789_v27 = vadd.f32 %v1065_v21, %v788_v25  ;;  %v1181_v28 = vpop.f32.mrb[23].mxu0 }
 0x6dd   :  { %v1628_v29 = vadd.f32 %v789_v27, %v1464_v1  ;;  %v794_v30 = vsel %vm69_vm0, %v1625_v26, 0.0 }
 0x6de   :  { %795 = vadd.xlane.f32.xlu0 %v794_v30 }
 0x6df   :  { %v797_v31 = vsel %vm69_vm0, %v1628_v29, 0.0 }
 0x6e0   :  { %798 = vadd.xlane.f32.xlu1 %v797_v31 }
 0x76b   :  { %v796_v32 = vpop.xlane.xlu0 %795 }
 0x76c   :  { %v800_v33 = vmul.f32 0.03125, %v796_v32 }
 0x76d   :  { %v799_v34 = vpop.xlane.xlu1 %798 }
 0x76e   :  { %v802_v35 = vsub.f32 %v1625_v26, %v800_v33  ;;  %v801_v0 = vmul.f32 0.03125, %v799_v34  ;;  %v1075_v33 = vld [vmem:[#allocation7 + $0x7] ss:$0 sm:$0xff] }
 0x770   :  { %v803_v36 = vsub.f32 %v1628_v29, %v801_v0  ;;  %v804_v37 = vmul.f32 %v802_v35, %v802_v35 }
 0x772   :  { %v806_v1 = vsel %vm69_vm0, %v804_v37, 0.0  ;;  %v805_v38 = vmul.f32 %v803_v36, %v803_v36 }
 0x773   :  { %807 = vadd.xlane.f32.xlu0 %v806_v1 }
 0x774   :  { %v809_v39 = vsel %vm69_vm0, %v805_v38, 0.0 }
 0x777   :  { %810 = vadd.xlane.f32.xlu0 %v809_v39 }
 0x800   :  { %v808_v43 = vpop.xlane.xlu0 %807 }
 0x801   :  { %v812_v44 = vmul.f32 0.03125, %v808_v43 }
 0x803   :  { %v814_v45 = vadd.f32 1e-05, %v812_v44 }
 0x804   :  { %v811_v47 = vpop.xlane.xlu0 %810 }
 0x805   :  { %1284 = vrsqrt.f32 %v814_v45  ;;  %v813_v48 = vmul.f32 0.03125, %v811_v47 }
 0x807   :  { %v815_v17 = vadd.f32 1e-05, %v813_v48 }
 0x809   :  { %1286 = vrsqrt.f32 %v815_v17 }
 0x80f   :  { %v1285_v49 = vpop.eup %1284 }
 0x810   :  { %v818_v42 = vmul.f32 %v1285_v49, %v802_v35 }
 0x812   :  { %v824_v19 = vmul.f32 %v1069_v46, %v818_v42 }
 0x813   :  { %v1287_v50 = vpop.eup %1286 }
 0x814   :  { %v819_v51 = vmul.f32 %v1287_v50, %v803_v36  ;;  %v830_v54 = vadd.f32 %v1070_v52, %v824_v19 }
 0x816   :  { %v825_v53 = vmul.f32 %v1069_v46, %v819_v51 }
 0x818   :  { %v831_v55 = vadd.f32 %v1070_v52, %v825_v53 }
 0x81a   :  { %v836_v56 = vpack.c.bf16 %v831_v55, %v830_v54 }
 0x81c   :  { %1187 = vmatmul.mubr.msk.bf16.vlgmr.msra.gmra.mrb[24].mxu0 %vm69_vm0, %v836_v56 }
 0x8ef   :  { %v890_v60 = vpop.f32.mrb[24].mxu0 }
 0x8f0   :  { %v891_v4 = vadd.f32 %v1071_v59, %v890_v60  ;;  %v1188_v5 = vpop.f32.mrb[25].mxu0 }
 0x8f1   :  { %v893_v6 = vpop.f32.mrb[26].mxu0 }
 0x8f2   :  { %v899_v7 = vmul.f32 0.044715, %v891_v4  ;;  %v894_v8 = vadd.f32 %v1071_v59, %v893_v6  ;;  %v1189_v9 = vpop.f32.mrb[27].mxu0  ;;  %v897_v25 = vmul.f32 0.5, %v891_v4 }
 0x8f4   :  { %v901_v10 = vmul.f32 %v899_v7, %v891_v4  ;;  %v900_v11 = vmul.f32 0.044715, %v894_v8  ;;  %v898_v27 = vmul.f32 0.5, %v894_v8 }
 0x8f6   :  { %v903_v12 = vmul.f32 %v901_v10, %v891_v4  ;;  %v902_v13 = vmul.f32 %v900_v11, %v894_v8 }
 0x8f8   :  { %v905_v14 = vadd.f32 %v903_v12, %v891_v4  ;;  %v904_v16 = vmul.f32 %v902_v13, %v894_v8 }
 0x8fa   :  { %v907_v18 = vmul.f32 0.7978846, %v905_v14  ;;  %v906_v21 = vadd.f32 %v904_v16, %v894_v8 }
 0x8fc   :  { %1288 = vtanh.f32 %v907_v18  ;;  %v908_v22 = vmul.f32 0.7978846, %v906_v21 }
 0x8fe   :  { %1290 = vtanh.f32 %v908_v22 }
 0x906   :  { %v1289_v15 = vpop.eup %1288 }
 0x907   :  { %v911_v23 = vadd.f32 1.0, %v1289_v15 }
 0x908   :  { %v1291_v24 = vpop.eup %1290 }
 0x909   :  { %v912_v28 = vadd.f32 1.0, %v1291_v24  ;;  %v913_v30 = vmul.f32 %v911_v23, %v897_v25 }
 0x90b   :  { %v914_v31 = vmul.f32 %v912_v28, %v898_v27 }
 0x90d   :  { %v931_v32 = vpack.c.bf16 %v914_v31, %v913_v30 }
 0x90f   :  { %1207 = vmatmul.mubr.bf16.vlgmr.msra.gmra.mrb[4].mxu1 %v931_v32 }
 0x9e2   :  { %v1018_v34 = vpop.f32.mrb[4].mxu1 }
 0x9e3   :  { %v1019_v35 = vadd.f32 %v1075_v33, %v1018_v34  ;;  %v1208_v0 = vpop.f32.mrb[5].mxu1 }
 0x9e4   :  { %v1021_v36 = vpop.f32.mrb[6].mxu1 }
 0x9e5   :  { %v1025_v37 = vadd.f32 %v1019_v35, %v1625_v26  ;;  %v1022_v1 = vadd.f32 %v1075_v33, %v1021_v36  ;;  %v1209_v38 = vpop.f32.mrb[7].mxu1 }
 0x9e7   :  { %1027 = vst.msk [vmem:[#allocation8] sm:$0xff] %vm69_vm0, %v1025_v37  ;;  %v1026_v39 = vadd.f32 %v1022_v1, %v1628_v29 }
 0x9e9   :  { %1028 = vst.msk [vmem:[#allocation8 + $0x8] sm:$0xff] %vm69_vm0, %v1026_v39 }
 0x9ea   :  { %1369 = shalt.err (!%p1366_p0)
}
 0x9eb   :  { %s1370_s29 = scalar_lea.hbm %s1669_s3, 256 }
 0x9ec   :  { %p1371_p1 = scmp.ne.s32.totalorder %s1669_s3, %s1370_s29  ;;  %p1374_p2 = scmp.lt.u32.totalorder %s1370_s29, %s1669_s3 }
 0x9ee   :  { %p1376_p3 = pnand %p1374_p2, %p1371_p1 }
 0x9f0   :  { %1379 = shalt.err (!%p1376_p3)
}
 0x9f1   :  { %1040 = dma.vmem_to_hbm [thread:$0]  %s1035_s25, 256, %s1669_s3, [#allocation4], %s1390_s1, %s1390_s1, %s1391_s9  }
 0x9f2   :  { %1384 = dma.done.wait [#allocation4], 256  }
 0x9f3   :  { %1385 = vsyncadd [#allocation4], 4294967040 }
 0x9f4   :  { %1044 = vsyncpa [#allocation3], 1 }
 0x9f5   :  { %1045 = vsyncpa [#allocation6], 1 }
 0x9f6   :  { %1046 = vsyncpa [#allocation4], 1 }

</bundles_post_ra>
